<compile_context>
chip_gen: v5e
topology: v5e:2x2
jax: 0.10.0
libtpu: 0.0.40
codegen_flags: <defaults>
</compile_context>

<pallas_src>
import jax
import jax.numpy as jnp
from jax.experimental import pallas as pl
from jax.experimental.pallas import tpu as pltpu

N_EMBD = 32
DROPOUT_RATE = 0.2
# keep iff bits >= threshold  =>  P(keep) = 1 - DROPOUT_RATE
_DROPOUT_THRESHOLD = int(round(DROPOUT_RATE * (2 ** 32)))
_KEEP_SCALE = 1.0 / (1.0 - DROPOUT_RATE)


def _ffn_math(x, w1, b1, w2, b2):
    h = jnp.dot(x, w1, preferred_element_type=jnp.float32)       # MXU, f32 accumulate
    h = jnp.maximum(h + b1, 0.0)                                  # bias + ReLU (VPU)
    y = jnp.dot(h, w2, preferred_element_type=jnp.float32)        # MXU, f32 accumulate
    return y + b2


def _ffn_eval_kernel(x_ref, w1_ref, b1_ref, w2_ref, b2_ref, o_ref):
    y = _ffn_math(x_ref[...], w1_ref[...], b1_ref[...], w2_ref[...], b2_ref[...])
    o_ref[...] = y.astype(o_ref.dtype)


def _ffn_train_kernel(x_ref, bits_ref, w1_ref, b1_ref, w2_ref, b2_ref, o_ref):
    y = _ffn_math(x_ref[...], w1_ref[...], b1_ref[...], w2_ref[...], b2_ref[...])
    # Inverted dropout via pure integer compare + select (no converts in the epilogue).
    keep = bits_ref[...] >= jnp.uint32(_DROPOUT_THRESHOLD)
    o_ref[...] = jnp.where(keep, y * jnp.float32(_KEEP_SCALE),
                           jnp.float32(0.0)).astype(o_ref.dtype)


def feed_forward(x, w1, b1, w2, b2, *, key=None, train=True, block_rows=512):
    """x: (B, T, C) float32; w1, w2: (C_in, C_out); b1, b2: (C,). Returns (B, T, C)."""
    B, T, C = x.shape
    M = B * T

    # Lane packing: fold `pack` consecutive rows into the 128-lane axis so every
    # vector load/store is a full unmasked 128-lane access and each MXU push does
    # `pack` rows of work. The row-major reshape (M, C) -> (M/pack, pack*C) is a
    # pure view; the weights become block-diagonal, biases are lane-tiled.
    pack = 128 // C if (0 < C <= 128 and 128 % C == 0) else 1
    Cp = pack * C

    x2d = x.reshape(M, C).astype(jnp.float32)

    mp = -(-M // pack)                               # packed rows needed (ceil div)
    if mp >= block_rows:
        tm = block_rows
    else:
        tm = max(8, ((mp + 7) // 8) * 8)             # sublane-aligned tile
    mp_pad = ((mp + tm - 1) // tm) * tm              # packed rows incl. tile padding
    m_pad = mp_pad * pack

    if m_pad != M:
        x2d = jnp.pad(x2d, ((0, m_pad - M), (0, 0)))
    xp = x2d.reshape(mp_pad, Cp)                     # free, row-major view

    eye = jnp.eye(pack, dtype=jnp.float32)
    w1p = jnp.kron(eye, w1.astype(jnp.float32))      # (Cp, Cp) block-diagonal
    w2p = jnp.kron(eye, w2.astype(jnp.float32))
    b1p = jnp.tile(b1.astype(jnp.float32), pack).reshape(1, Cp)
    b2p = jnp.tile(b2.astype(jnp.float32), pack).reshape(1, Cp)

    row_spec = pl.BlockSpec((tm, Cp), lambda i: (i, 0))   # pipelined per grid step
    w_spec = pl.BlockSpec((Cp, Cp), lambda i: (0, 0))     # resident across the grid
    b_spec = pl.BlockSpec((1, Cp), lambda i: (0, 0))      # resident across the grid

    grid = (mp_pad // tm,)

    flops = 2 * 2 * mp_pad * Cp * Cp                      # two (tm,Cp)x(Cp,Cp) matmuls
    bytes_accessed = (2 * mp_pad * Cp + 2 * Cp * Cp + 2 * Cp) * 4
    if train:
        bytes_accessed += mp_pad * Cp * 4                 # dropout bits

    if train:
        if key is None:
            key = jax.random.PRNGKey(0)
        bits = jax.random.bits(key, (mp_pad, Cp), dtype=jnp.uint32)
        kernel = _ffn_train_kernel
        in_specs = [row_spec, row_spec, w_spec, b_spec, w_spec, b_spec]
        args = (xp, bits, w1p, b1p, w2p, b2p)
    else:
        kernel = _ffn_eval_kernel
        in_specs = [row_spec, w_spec, b_spec, w_spec, b_spec]
        args = (xp, w1p, b1p, w2p, b2p)

    outp = pl.pallas_call(
        kernel,
        out_shape=jax.ShapeDtypeStruct((mp_pad, Cp), jnp.float32),
        grid_spec=pltpu.PrefetchScalarGridSpec(
            num_scalar_prefetch=0,
            grid=grid,
            in_specs=in_specs,
            out_specs=row_spec,
        ),
        compiler_params=pltpu.CompilerParams(
            dimension_semantics=("parallel",),            # shard rows over v7x's 2 TCs
        ),
        cost_estimate=pl.CostEstimate(
            flops=flops, transcendentals=0, bytes_accessed=bytes_accessed),
    )(*args)

    # Undo the lane packing (free view) and strip padding.
    return outp.reshape(m_pad, C)[:M].reshape(B, T, C)


def _init_linear(key, fan_in, fan_out):
    # Mirror PyTorch nn.Linear default init: U(-1/sqrt(fan_in), 1/sqrt(fan_in)).
    kw, kb = jax.random.split(key)
    bound = 1.0 / jnp.sqrt(fan_in)
    w = jax.random.uniform(kw, (fan_in, fan_out), jnp.float32, -bound, bound)
    b = jax.random.uniform(kb, (fan_out,), jnp.float32, -bound, bound)
    return w, b


if __name__ == "__main__":
    key = jax.random.PRNGKey(0)
    kx, k1, k2, kd = jax.random.split(key, 4)

    B, T, C = 2, 8, N_EMBD
    x = jax.random.normal(kx, (B, T, C), jnp.float32)
    w1, b1 = _init_linear(k1, C, C)
    w2, b2 = _init_linear(k2, C, C)

    # Eval mode (dropout = identity): check against a pure-JAX reference.
    out_eval = feed_forward(x, w1, b1, w2, b2, train=False)
    jax.block_until_ready(out_eval)
    ref = jnp.maximum(x.reshape(-1, C) @ w1 + b1, 0.0) @ w2 + b2
    assert jnp.allclose(out_eval.reshape(-1, C), ref, atol=1e-5, rtol=1e-5)

    # Train mode: dropout is stochastic; check shape, drop fraction, and that kept
    # elements are exactly the eval output scaled by 1/(1-p).
    out_train = feed_forward(x, w1, b1, w2, b2, key=kd, train=True)
    jax.block_until_ready(out_train)
    assert out_train.shape == (B, T, C)
    frac_zero = float(jnp.mean(out_train == 0.0))
    assert 0.05 < frac_zero < 0.45, frac_zero
    kept = out_train != 0.0
    assert jnp.allclose(out_train[kept], (_KEEP_SCALE * out_eval)[kept],
                        atol=1e-5, rtol=1e-5)

    print("KERNEL_OK")
</pallas_src>

<mosaic_0001>
module attributes {stable_mosaic.version = 11 : i64} {
  func.func @_ffn_eval_kernel(%arg0: i32, %arg1: memref<8x128xf32, #tpu.memory_space<vmem>>, %arg2: memref<128x128xf32, #tpu.memory_space<vmem>>, %arg3: memref<1x128xf32, #tpu.memory_space<vmem>>, %arg4: memref<128x128xf32, #tpu.memory_space<vmem>>, %arg5: memref<1x128xf32, #tpu.memory_space<vmem>>, %arg6: memref<8x128xf32, #tpu.memory_space<vmem>>) attributes {dimension_semantics = [#tpu.dimension_semantics<parallel>], iteration_bounds = array<i64: 1>, scalar_prefetch = 0 : i64, scratch_operands = 0 : i64, tpu.core_type = #tpu.core_type<tc>, window_params = [{transform_indices = @transform_0, window_bounds = array<i64: 8, 128>}, {pipeline_mode = #tpu.pipeline_mode<synchronous>, transform_indices = @transform_1, window_bounds = array<i64: 128, 128>}, {pipeline_mode = #tpu.pipeline_mode<synchronous>, transform_indices = @transform_2, window_bounds = array<i64: 1, 128>}, {pipeline_mode = #tpu.pipeline_mode<synchronous>, transform_indices = @transform_3, window_bounds = array<i64: 128, 128>}, {pipeline_mode = #tpu.pipeline_mode<synchronous>, transform_indices = @transform_4, window_bounds = array<i64: 1, 128>}, {transform_indices = @transform_5, window_bounds = array<i64: 8, 128>}]} {
    %c0 = arith.constant 0 : index
    %c0_0 = arith.constant 0 : index
    %0 = vector.load %arg1[%c0, %c0_0] : memref<8x128xf32, #tpu.memory_space<vmem>>, vector<8x128xf32>
    %c0_1 = arith.constant 0 : index
    %c0_2 = arith.constant 0 : index
    %1 = vector.load %arg2[%c0_1, %c0_2] : memref<128x128xf32, #tpu.memory_space<vmem>>, vector<128x128xf32>
    %c0_3 = arith.constant 0 : index
    %c0_4 = arith.constant 0 : index
    %2 = vector.load %arg3[%c0_3, %c0_4] : memref<1x128xf32, #tpu.memory_space<vmem>>, vector<1x128xf32>
    %c0_5 = arith.constant 0 : index
    %c0_6 = arith.constant 0 : index
    %3 = vector.load %arg4[%c0_5, %c0_6] : memref<128x128xf32, #tpu.memory_space<vmem>>, vector<128x128xf32>
    %c0_7 = arith.constant 0 : index
    %c0_8 = arith.constant 0 : index
    %4 = vector.load %arg5[%c0_7, %c0_8] : memref<1x128xf32, #tpu.memory_space<vmem>>, vector<1x128xf32>
    %cst = arith.constant dense<0.000000e+00> : vector<8x128xf32>
    %5 = tpu.matmul %0, %1, %cst {dimension_numbers = #tpu.dot_dimension_numbers<[1], [0], [0], [1], [0, 0, 1, 1], [], []>} : vector<8x128xf32>, vector<128x128xf32>, vector<8x128xf32> -> vector<8x128xf32>
    %6 = vector.broadcast %2 : vector<1x128xf32> to vector<8x128xf32>
    %7 = arith.addf %5, %6 : vector<8x128xf32>
    %cst_9 = arith.constant 0.000000e+00 : f32
    %8 = vector.broadcast %cst_9 : f32 to vector<8x128xf32>
    %9 = arith.maximumf %7, %8 : vector<8x128xf32>
    %cst_10 = arith.constant dense<0.000000e+00> : vector<8x128xf32>
    %10 = tpu.matmul %9, %3, %cst_10 {dimension_numbers = #tpu.dot_dimension_numbers<[1], [0], [0], [1], [0, 0, 1, 1], [], []>} : vector<8x128xf32>, vector<128x128xf32>, vector<8x128xf32> -> vector<8x128xf32>
    %11 = vector.broadcast %4 : vector<1x128xf32> to vector<8x128xf32>
    %12 = arith.addf %10, %11 : vector<8x128xf32>
    %c0_11 = arith.constant 0 : index
    %c0_12 = arith.constant 0 : index
    %13 = vector.load %arg6[%c0_11, %c0_12] : memref<8x128xf32, #tpu.memory_space<vmem>>, vector<8x128xf32>
    tpu.vector_store %arg6[%c0_11, %c0_12], %12 {strides = array<i32>} : memref<8x128xf32, #tpu.memory_space<vmem>>, vector<8x128xf32>,
    return
  }
  func.func @transform_0(%arg0: i32) -> (i32, i32) {
    %c0_i32 = arith.constant 0 : i32
    %c0_i32_0 = arith.constant 0 : i32
    return %arg0, %c0_i32 : i32, i32
  }
  func.func @transform_1(%arg0: i32) -> (i32, i32) {
    %c0_i32 = arith.constant 0 : i32
    %c0_i32_0 = arith.constant 0 : i32
    %c0_i32_1 = arith.constant 0 : i32
    return %c0_i32, %c0_i32_0 : i32, i32
  }
  func.func @transform_2(%arg0: i32) -> (i32, i32) {
    %c0_i32 = arith.constant 0 : i32
    %c0_i32_0 = arith.constant 0 : i32
    %c0_i32_1 = arith.constant 0 : i32
    return %c0_i32, %c0_i32_0 : i32, i32
  }
  func.func @transform_3(%arg0: i32) -> (i32, i32) {
    %c0_i32 = arith.constant 0 : i32
    %c0_i32_0 = arith.constant 0 : i32
    %c0_i32_1 = arith.constant 0 : i32
    return %c0_i32, %c0_i32_0 : i32, i32
  }
  func.func @transform_4(%arg0: i32) -> (i32, i32) {
    %c0_i32 = arith.constant 0 : i32
    %c0_i32_0 = arith.constant 0 : i32
    %c0_i32_1 = arith.constant 0 : i32
    return %c0_i32, %c0_i32_0 : i32, i32
  }
  func.func @transform_5(%arg0: i32) -> (i32, i32) {
    %c0_i32 = arith.constant 0 : i32
    %c0_i32_0 = arith.constant 0 : i32
    return %arg0, %c0_i32 : i32, i32
  }
}

</mosaic_0001>

<bundles_post_ra>
// kernel: tpu_custom_call.1
= control target key start
LH: loop header
LB: loop body
LE: loop exit
PB: predicated region body
PF: predicated region fallthrough
CT: control target
= control target key end

     0   :  { %10 = vsyncpa [#allocation3], 0  ;;  %s331_s0 = inlined_call_operand.hbm [shape: f32[8,128], index: 0, kind: input, shape index: {}]   ;;  %s332_s1 = inlined_call_operand.hbm [shape: f32[128,128], index: 1, kind: input, shape index: {}]   ;;  %s333_s2 = inlined_call_operand.vmem [shape: f32[1,128], index: 2, kind: input, shape index: {}]   ;;  %s334_s3 = inlined_call_operand.hbm [shape: f32[128,128], index: 3, kind: input, shape index: {}]   ;;  %s335_s4 = inlined_call_operand.vmem [shape: f32[1,128], index: 4, kind: input, shape index: {}]   ;;  %s336_s5 = inlined_call_operand.hbm [shape: f32[8,128], index: 5, kind: output, shape index: {}]  }
   0x1   :  { %11 = vsyncpa [#allocation6], 0  ;;  %s28_s20 = sshll.u32 %s332_s1, 4  ;;  %s29_s20 = int_to_ptr.hbm [resolvable:$true] %s28_s20 }
   0x2   :  { %12 = vsyncpa [#allocation4], 0  ;;  %s277_s21 = smov [#allocation5]   ;;  %s18_s25 = sshll.u32 %s331_s0, 4  ;;  %s19_s25 = int_to_ptr.hbm [resolvable:$true] %s18_s25 }
   0x3   :  { %s30_s22 = sshll.u32 %s277_s21, 4  ;;  %s278_s26 = smov 128   ;;  %s31_s22 = int_to_ptr.vmem [resolvable:$true] %s30_s22 }
   0x4   :  { %s279_s27 = smov 8   ;;  %s280_s28 = smov [#allocation2]  }
   0x5   :  { %36 = dma.hbm_to_vmem [thread:$0]  %s29_s20, 2048, %s31_s22, [#allocation6], %s278_s26, %s278_s26, %s279_s27  }
   0x6   :  { %s20_s29 = sshll.u32 %s280_s28, 4  ;;  %s43_s7 = sshll.u32 %s334_s3, 4  ;;  %s21_s29 = int_to_ptr.vmem [resolvable:$true] %s20_s29  ;;  %s44_s7 = int_to_ptr.hbm [resolvable:$true] %s43_s7 }
   0x7   :  { %23 = dma.hbm_to_vmem [thread:$0]  %s19_s25, 128, %s21_s29, [#allocation3]  }
   0x8   :  { %s281_s1 = smov [#allocation7]  }
   0x9   :  { %s45_s8 = sshll.u32 %s281_s1, 4  ;;  %s46_s8 = int_to_ptr.vmem [resolvable:$true] %s45_s8 }
   0xa   :  { %51 = dma.hbm_to_vmem [thread:$0]  %s44_s7, 2048, %s46_s8, [#allocation6], %s278_s26, %s278_s26, %s279_s27  }
   0xb   :  { %271 = dma.done.wait [#allocation3], 128  }
   0xc   :  { %272 = vsyncadd [#allocation3], 4294967168 }
   0xd   :  { %273 = dma.done.wait [#allocation6], 4096  }
   0xe   :  { %274 = vsyncadd [#allocation6], 4294963200  ;;  %v82_v0 = vld [vmem:[#allocation5 + $0x78] sm:$0xff]  ;;  %v81_v1 = vld [vmem:[#allocation5 + $0x70] sm:$0xff]  ;;  %s282_s11 = smov [#allocation8]   ;;  %s156_s15 = sshll.u32 %s336_s5, 4  ;;  %s157_s15 = int_to_ptr.hbm [resolvable:$true] %s156_s15 }
   0xf   :  { %104 = vmatpush.msra.mxu0 %v82_v0  ;;  %v80_v2 = vld [vmem:[#allocation5 + $0x68] sm:$0xff]  ;;  %v79_v3 = vld [vmem:[#allocation5 + $0x60] sm:$0xff]  ;;  %v99_v4 = vld [vmem:[#allocation7 + $0x78] sm:$0xff]  ;;  %s154_s12 = sshll.u32 %s282_s11, 4  ;;  %s155_s12 = int_to_ptr.vmem [resolvable:$true] %s154_s12 }
  0x10   :  { %v78_v5 = vld [vmem:[#allocation5 + $0x58] sm:$0xff]  ;;  %128 = vmatpush.msra.mxu1 %v99_v4  ;;  %v98_v6 = vld [vmem:[#allocation7 + $0x70] sm:$0xff]  ;;  %v97_v7 = vld [vmem:[#allocation7 + $0x68] sm:$0xff] }
  0x11   :  { %105 = vmatpush.msra.mxu0 %v81_v1  ;;  %v77_v8 = vld [vmem:[#allocation5 + $0x50] sm:$0xff]  ;;  %v96_v9 = vld [vmem:[#allocation7 + $0x60] sm:$0xff]  ;;  %v76_v10 = vld [vmem:[#allocation5 + $0x48] sm:$0xff] }
  0x12   :  { %129 = vmatpush.msra.mxu1 %v98_v6  ;;  %v95_v11 = vld [vmem:[#allocation7 + $0x58] sm:$0xff]  ;;  %v75_v12 = vld [vmem:[#allocation5 + $0x40] sm:$0xff]  ;;  %v94_v13 = vld [vmem:[#allocation7 + $0x50] sm:$0xff] }
  0x13   :  { %106 = vmatpush.msra.mxu0 %v80_v2  ;;  %v74_v14 = vld [vmem:[#allocation5 + $0x38] sm:$0xff]  ;;  %v93_v15 = vld [vmem:[#allocation7 + $0x48] sm:$0xff]  ;;  %v73_v16 = vld [vmem:[#allocation5 + $0x30] sm:$0xff] }
  0x14   :  { %130 = vmatpush.msra.mxu1 %v97_v7  ;;  %v92_v17 = vld [vmem:[#allocation7 + $0x40] sm:$0xff]  ;;  %v72_v18 = vld [vmem:[#allocation5 + $0x28] sm:$0xff]  ;;  %v91_v19 = vld [vmem:[#allocation7 + $0x38] sm:$0xff] }
  0x15   :  { %107 = vmatpush.msra.mxu0 %v79_v3  ;;  %v71_v20 = vld [vmem:[#allocation5 + $0x20] sm:$0xff]  ;;  %v90_v21 = vld [vmem:[#allocation7 + $0x30] sm:$0xff]  ;;  %v70_v22 = vld [vmem:[#allocation5 + $0x18] sm:$0xff] }
  0x16   :  { %131 = vmatpush.msra.mxu1 %v96_v9  ;;  %v89_v23 = vld [vmem:[#allocation7 + $0x28] sm:$0xff]  ;;  %v69_v24 = vld [vmem:[#allocation5 + $0x10] sm:$0xff]  ;;  %v88_v25 = vld [vmem:[#allocation7 + $0x20] sm:$0xff] }
  0x17   :  { %108 = vmatpush.msra.mxu0 %v78_v5  ;;  %v68_v26 = vld [vmem:[#allocation5 + $0x8] sm:$0xff]  ;;  %v87_v27 = vld [vmem:[#allocation7 + $0x18] sm:$0xff]  ;;  %v67_v28 = vld [vmem:[#allocation5] sm:$0xff] }
  0x18   :  { %132 = vmatpush.msra.mxu1 %v95_v11  ;;  %v66_v29 = vld [vmem:[#allocation2] sm:$0xff]  ;;  %v86_v30 = vld [vmem:[#allocation7 + $0x10] sm:$0xff]  ;;  %v85_v31 = vld [vmem:[#allocation7 + $0x8] sm:$0xff] }
  0x19   :  { %109 = vmatpush.msra.mxu0 %v77_v8  ;;  %v84_v32 = vld [vmem:[#allocation7] sm:$0xff]  ;;  %v173_v33 = vld [vmem:[%s333_s2] ss:$0 sm:$0xff] }
  0x1a   :  { %133 = vmatpush.msra.mxu1 %v94_v13  ;;  %v174_v37 = vld [vmem:[%s335_s4] ss:$0 sm:$0xff] }
  0x1b   :  { %110 = vmatpush.msra.mxu0 %v76_v10 }
  0x1c   :  { %134 = vmatpush.msra.mxu1 %v93_v15 }
  0x1d   :  { %111 = vmatpush.msra.mxu0 %v75_v12 }
  0x1e   :  { %135 = vmatpush.msra.mxu1 %v92_v17 }
  0x1f   :  { %112 = vmatpush.msra.mxu0 %v74_v14 }
  0x20   :  { %136 = vmatpush.msra.mxu1 %v91_v19 }
  0x21   :  { %113 = vmatpush.msra.mxu0 %v73_v16 }
  0x22   :  { %137 = vmatpush.msra.mxu1 %v90_v21 }
  0x23   :  { %114 = vmatpush.msra.mxu0 %v72_v18 }
  0x24   :  { %138 = vmatpush.msra.mxu1 %v89_v23 }
  0x25   :  { %115 = vmatpush.msra.mxu0 %v71_v20 }
  0x26   :  { %139 = vmatpush.msra.mxu1 %v88_v25 }
  0x27   :  { %116 = vmatpush.msra.mxu0 %v70_v22 }
  0x28   :  { %140 = vmatpush.msra.mxu1 %v87_v27 }
  0x29   :  { %117 = vmatpush.msra.mxu0 %v69_v24 }
  0x2a   :  { %141 = vmatpush.msra.mxu1 %v86_v30 }
  0x2b   :  { %118 = vmatpush.msra.mxu0 %v68_v26 }
  0x2c   :  { %142 = vmatpush.msra.mxu1 %v85_v31 }
  0x2d   :  { %119 = vmatpush.msra.mxu0 %v67_v28 }
  0x2e   :  { %120 = vmatmul.f32.vlgmr.msra.gmra.mxu0 %v66_v29  ;;  %143 = vmatpush.msra.mxu1 %v84_v32 }
  0xab   :  { %v121_v34 = vpop.f32.mrf.mxu0 }
  0xac   :  { %v122_v35 = vadd.f32 %v173_v33, %v121_v34 }
  0xae   :  { %v124_v36 = vmax.f32 %v122_v35, 0.0 }
  0xb0   :  { %144 = vmatmul.f32.vlgmr.msra.gmra.mxu1 %v124_v36 }
 0x12d   :  { %v145_v38 = vpop.f32.mrf.mxu1 }
 0x12e   :  { %v146_v39 = vadd.f32 %v174_v37, %v145_v38 }
 0x130   :  { %148 = vst [vmem:[#allocation8] sm:$0xff] %v146_v39 }
 0x131   :  { %159 = dma.vmem_to_hbm [thread:$0]  %s155_s12, 128, %s157_s15, [#allocation4]  }
 0x132   :  { %275 = dma.done.wait [#allocation4], 128  }
 0x133   :  { %276 = vsyncadd [#allocation4], 4294967168 }
 0x134   :  { %164 = vsyncpa [#allocation3], 1 }
 0x135   :  { %165 = vsyncpa [#allocation6], 1 }
 0x136   :  { %166 = vsyncpa [#allocation4], 1 }

</bundles_post_ra>
